<compile_context>
chip_gen: v7x
topology: tpu7x:2x2x1
jax: 0.10.0
libtpu: 0.0.40
codegen_flags: <defaults>
</compile_context>

<pallas_src>
import math
import jax
import jax.numpy as jnp
from jax.experimental import pallas as pl
from jax.experimental.pallas import tpu as pltpu


def _round_up(x, m):
    return (x + m - 1) // m * m


def _pick_tile(n_p, preferred):
    """Largest multiple of 128 <= preferred that divides n_p (n_p % 128 == 0)."""
    t = max(128, (min(preferred, n_p) // 128) * 128)
    while n_p % t != 0:
        t -= 128
    return t


# ---------------- Fused kernel: y = ReLU(A @ (X @ W) + bias) ----------------
def gcn_fused_kernel(a_ref, x_ref, w_ref, b_ref, o_ref):
    k = pl.program_id(1)

    @pl.when(k == 0)
    def _():
        o_ref[...] = jnp.zeros_like(o_ref)

    # support slab for this reduction tile, computed on the fly (W resident).
    s = jnp.dot(x_ref[...], w_ref[...], preferred_element_type=jnp.float32)
    # main (memory-bound) matmul; accumulate directly into the resident output block.
    o_ref[...] += jnp.dot(a_ref[...], s, preferred_element_type=jnp.float32)

    @pl.when(k == pl.num_programs(1) - 1)
    def _():
        # bias add + ReLU only in the finalize branch (steady state is MXU-only).
        o_ref[...] = jnp.maximum(o_ref[...] + b_ref[...], 0.0)


def graph_convolution(adj_norm, x, weight, bias, *, tm=512, tk=1024):
    n, f_in = x.shape
    f_out = weight.shape[1]

    f_out_p = _round_up(f_out, 128)   # lane-dense output, no masked stores
    n_p = _round_up(n, 128)           # minimal alignment padding
    tm = _pick_tile(n_p, tm)          # row tile (divides n_p)
    tk = _pick_tile(n_p, tk)          # reduction tile (divides n_p)

    # Pad only when necessary (shapes are static; these branches are Python-level).
    a_p = adj_norm.astype(jnp.float32)
    x_p = x.astype(jnp.float32)
    if n_p != n:
        a_p = jnp.pad(a_p, ((0, n_p - n), (0, n_p - n)))
        x_p = jnp.pad(x_p, ((0, n_p - n), (0, 0)))
    w_p = weight.astype(jnp.float32)
    b_p = bias.astype(jnp.float32).reshape(1, f_out)
    if f_out_p != f_out:
        w_p = jnp.pad(w_p, ((0, 0), (0, f_out_p - f_out)))
        b_p = jnp.pad(b_p, ((0, 0), (0, f_out_p - f_out)))

    n_row_tiles = n_p // tm
    out_p = pl.pallas_call(
        gcn_fused_kernel,
        out_shape=jax.ShapeDtypeStruct((n_p, f_out_p), jnp.float32),
        grid_spec=pltpu.PrefetchScalarGridSpec(
            num_scalar_prefetch=0,
            grid=(n_row_tiles, n_p // tk),
            in_specs=[
                pl.BlockSpec((tm, tk), lambda i, k: (i, k)),          # A stream
                pl.BlockSpec((tk, f_in), lambda i, k: (k, 0)),        # X k-slab
                pl.BlockSpec((f_in, f_out_p), lambda i, k: (0, 0)),   # W resident
                pl.BlockSpec((1, f_out_p), lambda i, k: (0, 0)),      # bias resident
            ],
            out_specs=pl.BlockSpec((tm, f_out_p), lambda i, k: (i, 0)),
        ),
        compiler_params=pltpu.CompilerParams(
            dimension_semantics=("parallel", "arbitrary")),
        cost_estimate=pl.CostEstimate(
            flops=2 * n_p * n_p * f_out_p
                  + 2 * n_row_tiles * n_p * f_in * f_out_p,
            transcendentals=0,
            bytes_accessed=(n_p * n_p * 4                       # A
                            + n_row_tiles * n_p * f_in * 4      # X re-read per row tile
                            + f_in * f_out_p * 4 + f_out_p * 4  # W + bias
                            + n_p * f_out_p * 4)),              # output write
    )(a_p, x_p, w_p, b_p)

    # Padded tail rows hold ReLU(bias); sliced off here (never consumed unsliced).
    return out_p[:n, :f_out]


def row_normalize(adj):
    """Row-normalize a dense adjacency matrix (matches the numpy `normalize`)."""
    rowsum = adj.sum(axis=1)
    r_inv = jnp.where(rowsum == 0.0, 0.0, 1.0 / rowsum)
    return adj * r_inv[:, None]


def reference(adj_norm, x, weight, bias):
    support = x @ weight
    out = adj_norm @ support
    return jax.nn.relu(out + bias[None, :])


def _make_inputs(key, n_nodes, in_features, out_features):
    k_adj, k_x, k_w, k_b = jax.random.split(key, 4)
    adj_raw = (jax.random.uniform(k_adj, (n_nodes, n_nodes)) > 0.7).astype(jnp.float32)
    adj_raw = jnp.clip(adj_raw + jnp.eye(n_nodes, dtype=jnp.float32), 0.0, 1.0)
    adj_norm = row_normalize(adj_raw)
    x = jax.random.normal(k_x, (n_nodes, in_features), dtype=jnp.float32)
    stdv = 1.0 / math.sqrt(out_features)
    weight = jax.random.uniform(
        k_w, (in_features, out_features), minval=-stdv, maxval=stdv, dtype=jnp.float32)
    bias = jax.random.uniform(
        k_b, (out_features,), minval=-stdv, maxval=stdv, dtype=jnp.float32)
    return adj_norm, x, weight, bias


# TODO(synk): sparse_inputs=True (torch.sparse.mm) and chebyshev_polynomials>0
#             (host-side numpy eig/Chebyshev basis) are not reproduced; this
#             covers the default dense, K=0 path (a single normalized adjacency).

if __name__ == "__main__":
    key = jax.random.PRNGKey(0)
    k1, k2 = jax.random.split(key)

    # Small case (matches the toy module sizes).
    adj_norm, x, weight, bias = _make_inputs(k1, n_nodes=16, in_features=32, out_features=16)
    y = jax.block_until_ready(graph_convolution(adj_norm, x, weight, bias))
    y_ref = reference(adj_norm, x, weight, bias)
    assert y.shape == y_ref.shape
    assert jnp.allclose(y, y_ref, atol=2e-2, rtol=2e-2), "mismatch vs reference (small)"

    # Larger case: exercises multiple row tiles + padding to a non-trivial n_p (768).
    adj_norm2, x2, weight2, bias2 = _make_inputs(k2, n_nodes=700, in_features=32, out_features=16)
    y2 = jax.block_until_ready(graph_convolution(adj_norm2, x2, weight2, bias2))
    y2_ref = reference(adj_norm2, x2, weight2, bias2)
    assert y2.shape == y2_ref.shape
    assert jnp.allclose(y2, y2_ref, atol=2e-2, rtol=2e-2), "mismatch vs reference (tiled)"

    print("KERNEL_OK")
</pallas_src>

<mosaic_0001>
module attributes {stable_mosaic.version = 11 : i64} {
  func.func @gcn_fused_kernel(%arg0: i32, %arg1: i32, %arg2: memref<128x128xf32, #tpu.memory_space<vmem>>, %arg3: memref<128x32xf32, #tpu.memory_space<vmem>>, %arg4: memref<32x128xf32, #tpu.memory_space<vmem>>, %arg5: memref<1x128xf32, #tpu.memory_space<vmem>>, %arg6: memref<128x128xf32, #tpu.memory_space<vmem>>) attributes {dimension_semantics = [#tpu.dimension_semantics<parallel>, #tpu.dimension_semantics<arbitrary>], iteration_bounds = array<i64: 1, 1>, scalar_prefetch = 0 : i64, scratch_operands = 0 : i64, tpu.core_type = #tpu.core_type<tc>, window_params = [{transform_indices = @transform_0, window_bounds = array<i64: 128, 128>}, {transform_indices = @transform_1, window_bounds = array<i64: 128, 32>}, {pipeline_mode = #tpu.pipeline_mode<synchronous>, transform_indices = @transform_2, window_bounds = array<i64: 32, 128>}, {pipeline_mode = #tpu.pipeline_mode<synchronous>, transform_indices = @transform_3, window_bounds = array<i64: 1, 128>}, {transform_indices = @transform_4, window_bounds = array<i64: 128, 128>}]} {
    %c0_i32 = arith.constant 0 : i32
    %0 = arith.cmpi eq, %arg1, %c0_i32 : i32
    %1 = arith.extui %0 : i1 to i32
    %c0_i32_0 = arith.constant 0 : i32
    %2 = arith.cmpi ne, %1, %c0_i32_0 : i32
    scf.if %2 {
      %cst_13 = arith.constant 0.000000e+00 : f32
      %14 = vector.broadcast %cst_13 : f32 to vector<128x128xf32>
      %c0_14 = arith.constant 0 : index
      %c0_15 = arith.constant 0 : index
      %15 = vector.load %arg6[%c0_14, %c0_15] : memref<128x128xf32, #tpu.memory_space<vmem>>, vector<128x128xf32>
      tpu.vector_store %arg6[%c0_14, %c0_15], %14 {strides = array<i32>} : memref<128x128xf32, #tpu.memory_space<vmem>>, vector<128x128xf32>,
    } else {
    }
    %c0 = arith.constant 0 : index
    %c0_1 = arith.constant 0 : index
    %3 = vector.load %arg3[%c0, %c0_1] : memref<128x32xf32, #tpu.memory_space<vmem>>, vector<128x32xf32>
    %c0_2 = arith.constant 0 : index
    %c0_3 = arith.constant 0 : index
    %4 = vector.load %arg4[%c0_2, %c0_3] : memref<32x128xf32, #tpu.memory_space<vmem>>, vector<32x128xf32>
    %cst = arith.constant dense<0.000000e+00> : vector<128x128xf32>
    %5 = tpu.matmul %3, %4, %cst {dimension_numbers = #tpu.dot_dimension_numbers<[1], [0], [0], [1], [0, 0, 1, 1], [], []>} : vector<128x32xf32>, vector<32x128xf32>, vector<128x128xf32> -> vector<128x128xf32>
    %c0_4 = arith.constant 0 : index
    %c0_5 = arith.constant 0 : index
    %6 = vector.load %arg6[%c0_4, %c0_5] : memref<128x128xf32, #tpu.memory_space<vmem>>, vector<128x128xf32>
    %c0_6 = arith.constant 0 : index
    %c0_7 = arith.constant 0 : index
    %7 = vector.load %arg2[%c0_6, %c0_7] : memref<128x128xf32, #tpu.memory_space<vmem>>, vector<128x128xf32>
    %cst_8 = arith.constant dense<0.000000e+00> : vector<128x128xf32>
    %8 = tpu.matmul %7, %5, %cst_8 {dimension_numbers = #tpu.dot_dimension_numbers<[1], [0], [0], [1], [0, 0, 1, 1], [], []>} : vector<128x128xf32>, vector<128x128xf32>, vector<128x128xf32> -> vector<128x128xf32>
    %9 = arith.addf %6, %8 : vector<128x128xf32>
    %c0_9 = arith.constant 0 : index
    %c0_10 = arith.constant 0 : index
    %10 = vector.load %arg6[%c0_9, %c0_10] : memref<128x128xf32, #tpu.memory_space<vmem>>, vector<128x128xf32>
    tpu.vector_store %arg6[%c0_9, %c0_10], %9 {strides = array<i32>} : memref<128x128xf32, #tpu.memory_space<vmem>>, vector<128x128xf32>,
    %c0_i32_11 = arith.constant 0 : i32
    %11 = arith.cmpi eq, %arg1, %c0_i32_11 : i32
    %12 = arith.extui %11 : i1 to i32
    %c0_i32_12 = arith.constant 0 : i32
    %13 = arith.cmpi ne, %12, %c0_i32_12 : i32
    scf.if %13 {
      %c0_13 = arith.constant 0 : index
      %c0_14 = arith.constant 0 : index
      %14 = vector.load %arg6[%c0_13, %c0_14] : memref<128x128xf32, #tpu.memory_space<vmem>>, vector<128x128xf32>
      %c0_15 = arith.constant 0 : index
      %c0_16 = arith.constant 0 : index
      %15 = vector.load %arg5[%c0_15, %c0_16] : memref<1x128xf32, #tpu.memory_space<vmem>>, vector<1x128xf32>
      %16 = vector.broadcast %15 : vector<1x128xf32> to vector<128x128xf32>
      %17 = arith.addf %14, %16 : vector<128x128xf32>
      %cst_17 = arith.constant 0.000000e+00 : f32
      %18 = vector.broadcast %cst_17 : f32 to vector<128x128xf32>
      %19 = arith.maximumf %17, %18 : vector<128x128xf32>
      %c0_18 = arith.constant 0 : index
      %c0_19 = arith.constant 0 : index
      %20 = vector.load %arg6[%c0_18, %c0_19] : memref<128x128xf32, #tpu.memory_space<vmem>>, vector<128x128xf32>
      tpu.vector_store %arg6[%c0_18, %c0_19], %19 {strides = array<i32>} : memref<128x128xf32, #tpu.memory_space<vmem>>, vector<128x128xf32>,
    } else {
    }
    return
  }
  func.func @transform_0(%arg0: i32, %arg1: i32) -> (i32, i32) {
    %c0_i32 = arith.constant 0 : i32
    return %arg0, %arg1 : i32, i32
  }
  func.func @transform_1(%arg0: i32, %arg1: i32) -> (i32, i32) {
    %c0_i32 = arith.constant 0 : i32
    %c0_i32_0 = arith.constant 0 : i32
    return %arg1, %c0_i32 : i32, i32
  }
  func.func @transform_2(%arg0: i32, %arg1: i32) -> (i32, i32) {
    %c0_i32 = arith.constant 0 : i32
    %c0_i32_0 = arith.constant 0 : i32
    %c0_i32_1 = arith.constant 0 : i32
    return %c0_i32, %c0_i32_0 : i32, i32
  }
  func.func @transform_3(%arg0: i32, %arg1: i32) -> (i32, i32) {
    %c0_i32 = arith.constant 0 : i32
    %c0_i32_0 = arith.constant 0 : i32
    %c0_i32_1 = arith.constant 0 : i32
    return %c0_i32, %c0_i32_0 : i32, i32
  }
  func.func @transform_4(%arg0: i32, %arg1: i32) -> (i32, i32) {
    %c0_i32 = arith.constant 0 : i32
    %c0_i32_0 = arith.constant 0 : i32
    return %arg0, %c0_i32 : i32, i32
  }
}

</mosaic_0001>

<bundles_post_ra>
// kernel: tpu_custom_call.1
= control target key start
LH: loop header
LB: loop body
LE: loop exit
PB: predicated region body
PF: predicated region fallthrough
CT: control target
= control target key end

     0   :  { %vm58_vm0 = vcmask 261120   ;;  %s959_s0 = inlined_call_operand.vmem [shape: f32[128,128], index: 0, kind: input, shape index: {}]   ;;  %s960_s1 = inlined_call_operand.vmem [shape: f32[128,32], index: 1, kind: input, shape index: {}]   ;;  %s961_s2 = inlined_call_operand.vmem [shape: f32[32,128], index: 2, kind: input, shape index: {}]   ;;  %s962_s3 = inlined_call_operand.vmem [shape: f32[1,128], index: 3, kind: input, shape index: {}]   ;;  %s963_s4 = inlined_call_operand.hbm [shape: f32[128,128], index: 4, kind: output, shape index: {}]  }
   0x1   :  { %v54_v0 = vld [vmem:[%s961_s2] sm:$0xff]  ;;  %v55_v1 = vld [vmem:[%s961_s2 + $0x8] sm:$0xff]  ;;  %v56_v2 = vld [vmem:[%s961_s2 + $0x10] sm:$0xff] }
   0x2   :  { %v708_v3 = vpack.c.bf16 %v55_v1, %v54_v0  ;;  %v57_v4 = vld [vmem:[%s961_s2 + $0x18] sm:$0xff]  ;;  %v38_v5 = vld [vmem:[%s960_s1] sm:$0xff] }
   0x3   :  { %v712_v6 = vpack.c.bf16 %v57_v4, %v56_v2  ;;  %628 = vmatprep.mubr.msk.f32.mxu0 %vm58_vm0, %v38_v5 }
   0x4   :  { %709 = vmatprep.subr.bf16.mxu0 %v708_v3 }
   0x5   :  { %711 = vmatpush3.bf16.msra.mxu0 %v708_v3 }
   0x6   :  { %713 = vmatprep.subr.bf16.mxu0 %v712_v6 }
   0x7   :  { %9 = vsyncpa [#allocation3], 0  ;;  %v39_v7 = vld [vmem:[%s960_s1 + $0x8] sm:$0xff]  ;;  %v40_v8 = vld [vmem:[%s960_s1 + $0x10] sm:$0xff] }
   0x8   :  { %v41_v9 = vld [vmem:[%s960_s1 + $0x18] sm:$0xff]  ;;  %v42_v10 = vld [vmem:[%s960_s1 + $0x20] sm:$0xff]  ;;  %v43_v11 = vld [vmem:[%s960_s1 + $0x28] sm:$0xff] }
   0x9   :  { %715 = vmatpush3.bf16.msra.mxu0 %v712_v6  ;;  %v44_v12 = vld [vmem:[%s960_s1 + $0x30] sm:$0xff]  ;;  %v45_v13 = vld [vmem:[%s960_s1 + $0x38] sm:$0xff]  ;;  %v46_v14 = vld [vmem:[%s960_s1 + $0x40] sm:$0xff] }
   0xa   :  { %v47_v15 = vld [vmem:[%s960_s1 + $0x48] sm:$0xff]  ;;  %v48_v16 = vld [vmem:[%s960_s1 + $0x50] sm:$0xff]  ;;  %v49_v17 = vld [vmem:[%s960_s1 + $0x58] sm:$0xff] }
   0xb   :  { %v50_v18 = vld [vmem:[%s960_s1 + $0x60] sm:$0xff]  ;;  %v51_v19 = vld [vmem:[%s960_s1 + $0x68] sm:$0xff]  ;;  %v52_v20 = vld [vmem:[%s960_s1 + $0x70] sm:$0xff] }
   0xc   :  { %629 = vmatmul.mubr.msk.f32.vlgmr.msra.gmra.mrb[0].mxu0 %vm58_vm0, %v39_v7  ;;  %v53_v21 = vld [vmem:[%s960_s1 + $0x78] sm:$0xff]  ;;  %v274_v22 = vld [vmem:[%s959_s0 + $0x30] sm:$0xff]  ;;  %v268_v23 = vld [vmem:[%s959_s0] sm:$0xff] }
   0xd   :  { %631 = vmatprep.mubr.msk.f32.mxu0 %vm58_vm0, %v40_v8  ;;  %693 = vmatprep.mubr.f32.mxu1 %v274_v22  ;;  %v275_v48 = vld [vmem:[%s959_s0 + $0x38] sm:$0xff]  ;;  %v269_v49 = vld [vmem:[%s959_s0 + $0x8] sm:$0xff]  ;;  %v276_v50 = vld [vmem:[%s959_s0 + $0x40] sm:$0xff] }
   0xe   :  { %v270_v51 = vld [vmem:[%s959_s0 + $0x10] sm:$0xff]  ;;  %v277_v52 = vld [vmem:[%s959_s0 + $0x48] sm:$0xff]  ;;  %v271_v53 = vld [vmem:[%s959_s0 + $0x18] sm:$0xff] }
   0xf   :  { %v278_v54 = vld [vmem:[%s959_s0 + $0x50] sm:$0xff]  ;;  %v272_v55 = vld [vmem:[%s959_s0 + $0x20] sm:$0xff]  ;;  %v279_v56 = vld [vmem:[%s959_s0 + $0x58] sm:$0xff] }
  0x10   :  { %632 = vmatmul.mubr.msk.f32.gmra.mrb[2].mxu0 %vm58_vm0, %v41_v9  ;;  %v273_v57 = vld [vmem:[%s959_s0 + $0x28] sm:$0xff]  ;;  %v280_v58 = vld [vmem:[%s959_s0 + $0x60] sm:$0xff]  ;;  %v282_v60 = vld [vmem:[%s959_s0 + $0x70] sm:$0xff] }
  0x11   :  { %634 = vmatprep.mubr.msk.f32.mxu0 %vm58_vm0, %v42_v10  ;;  %v281_v59 = vld [vmem:[%s959_s0 + $0x68] sm:$0xff]  ;;  %v283_v61 = vld [vmem:[%s959_s0 + $0x78] sm:$0xff]  ;;  %v567_v63 = vld [vmem:[%s962_s3] ss:$0 sm:$0xff]  ;;  %s792_s0 = smov [#allocation2]  }
  0x12   :  { %s540_s3 = sshll.u32 %s792_s0, 4  ;;  %s541_s3 = int_to_ptr.vmem [resolvable:$true] %s540_s3 }
  0x13   :  { %s768_s6 = scalar_lea.vmem %s541_s3, 2048  ;;  %p773_p1 = scmp.lt.s32.totalorder %s541_s3, %s541_s3 }
  0x14   :  { %635 = vmatmul.mubr.msk.f32.gmra.mrb[4].mxu0 %vm58_vm0, %v43_v11  ;;  %p769_p0 = scmp.ne.s32.totalorder %s541_s3, %s768_s6  ;;  %p774_p2 = scmp.lt.s32.totalorder %s768_s6, %s768_s6 }
  0x15   :  { %637 = vmatprep.mubr.msk.f32.mxu0 %vm58_vm0, %v44_v12 }
  0x16   :  { %p775_p3 = por %p774_p2, %p773_p1 }
  0x18   :  { %638 = vmatmul.mubr.msk.f32.gmra.mrb[6].mxu0 %vm58_vm0, %v45_v13  ;;  %p776_p4 = pnand %p775_p3, %p769_p0 }
  0x19   :  { %640 = vmatprep.mubr.msk.f32.mxu0 %vm58_vm0, %v46_v14 }
  0x1c   :  { %641 = vmatmul.mubr.msk.f32.gmra.mrb[8].mxu0 %vm58_vm0, %v47_v15 }
  0x1d   :  { %643 = vmatprep.mubr.msk.f32.mxu0 %vm58_vm0, %v48_v16 }
  0x20   :  { %644 = vmatmul.mubr.msk.f32.gmra.mrb[10].mxu0 %vm58_vm0, %v49_v17 }
  0x21   :  { %646 = vmatprep.mubr.msk.f32.mxu0 %vm58_vm0, %v50_v18 }
  0x24   :  { %647 = vmatmul.mubr.msk.f32.gmra.mrb[12].mxu0 %vm58_vm0, %v51_v19 }
  0x25   :  { %649 = vmatprep.mubr.msk.f32.mxu0 %vm58_vm0, %v52_v20 }
  0x28   :  { %650 = vmatmul.mubr.msk.f32.gmra.mrb[14].mxu0 %vm58_vm0, %v53_v21 }
  0x29   :  { %684 = vmatprep.mubr.f32.mxu0 %v268_v23 }
  0xdf   :  { %v630_v24 = vpop.f32.mrb[0].mxu0 }
  0xe0   :  { %v173_v25 = vpop.f32.mrb[1].mxu0 }
  0xe1   :  { %v716_v26 = vpack.c.bf16 %v630_v24, %v173_v25 }
  0xe3   :  { %v633_v27 = vpop.f32.mrb[2].mxu0  ;;  %717 = vmatprep.subr.bf16.mxu0 %v716_v26  ;;  %748 = vmatprep.subr.bf16.mxu1 %v716_v26 }
  0xe4   :  { %v183_v28 = vpop.f32.mrb[3].mxu0  ;;  %719 = vmatpush3.bf16.msra.mxu0 %v716_v26  ;;  %756 = vmatpush3.bf16.msra.mxu1 %v716_v26 }
  0xe5   :  { %v720_v29 = vpack.c.bf16 %v633_v27, %v183_v28 }
  0xe7   :  { %v636_v30 = vpop.f32.mrb[4].mxu0  ;;  %721 = vmatprep.subr.bf16.mxu0 %v720_v29  ;;  %749 = vmatprep.subr.bf16.mxu1 %v720_v29 }
  0xe8   :  { %v193_v31 = vpop.f32.mrb[5].mxu0  ;;  %723 = vmatpush3.bf16.msra.mxu0 %v720_v29  ;;  %757 = vmatpush3.bf16.msra.mxu1 %v720_v29 }
  0xe9   :  { %v724_v32 = vpack.c.bf16 %v636_v30, %v193_v31 }
  0xeb   :  { %v639_v33 = vpop.f32.mrb[6].mxu0  ;;  %725 = vmatprep.subr.bf16.mxu0 %v724_v32  ;;  %750 = vmatprep.subr.bf16.mxu1 %v724_v32 }
  0xec   :  { %v203_v34 = vpop.f32.mrb[7].mxu0  ;;  %727 = vmatpush3.bf16.msra.mxu0 %v724_v32  ;;  %758 = vmatpush3.bf16.msra.mxu1 %v724_v32 }
  0xed   :  { %v728_v35 = vpack.c.bf16 %v639_v33, %v203_v34 }
  0xef   :  { %v642_v36 = vpop.f32.mrb[8].mxu0  ;;  %729 = vmatprep.subr.bf16.mxu0 %v728_v35  ;;  %751 = vmatprep.subr.bf16.mxu1 %v728_v35 }
  0xf0   :  { %v213_v37 = vpop.f32.mrb[9].mxu0  ;;  %731 = vmatpush3.bf16.msra.mxu0 %v728_v35  ;;  %759 = vmatpush3.bf16.msra.mxu1 %v728_v35 }
  0xf1   :  { %v732_v38 = vpack.c.bf16 %v642_v36, %v213_v37 }
  0xf3   :  { %v645_v39 = vpop.f32.mrb[10].mxu0  ;;  %733 = vmatprep.subr.bf16.mxu0 %v732_v38  ;;  %752 = vmatprep.subr.bf16.mxu1 %v732_v38 }
  0xf4   :  { %v223_v40 = vpop.f32.mrb[11].mxu0  ;;  %735 = vmatpush3.bf16.msra.mxu0 %v732_v38  ;;  %760 = vmatpush3.bf16.msra.mxu1 %v732_v38 }
  0xf5   :  { %v736_v41 = vpack.c.bf16 %v645_v39, %v223_v40 }
  0xf7   :  { %v648_v42 = vpop.f32.mrb[12].mxu0  ;;  %737 = vmatprep.subr.bf16.mxu0 %v736_v41  ;;  %753 = vmatprep.subr.bf16.mxu1 %v736_v41 }
  0xf8   :  { %v233_v43 = vpop.f32.mrb[13].mxu0  ;;  %739 = vmatpush3.bf16.msra.mxu0 %v736_v41  ;;  %761 = vmatpush3.bf16.msra.mxu1 %v736_v41 }
  0xf9   :  { %v740_v44 = vpack.c.bf16 %v648_v42, %v233_v43 }
  0xfb   :  { %v651_v45 = vpop.f32.mrb[14].mxu0  ;;  %741 = vmatprep.subr.bf16.mxu0 %v740_v44  ;;  %754 = vmatprep.subr.bf16.mxu1 %v740_v44 }
  0xfc   :  { %v243_v46 = vpop.f32.mrb[15].mxu0  ;;  %743 = vmatpush3.bf16.msra.mxu0 %v740_v44  ;;  %762 = vmatpush3.bf16.msra.mxu1 %v740_v44 }
  0xfd   :  { %v744_v47 = vpack.c.bf16 %v651_v45, %v243_v46 }
  0xff   :  { %745 = vmatprep.subr.bf16.mxu0 %v744_v47  ;;  %755 = vmatprep.subr.bf16.mxu1 %v744_v47 }
 0x100   :  { %747 = vmatpush3.bf16.msra.mxu0 %v744_v47  ;;  %763 = vmatpush3.bf16.msra.mxu1 %v744_v47 }
 0x103   :  { %694 = vmatmul.mubr.f32.vlgmr.msra.gmra.mrb[0].mxu1 %v275_v48  ;;  %685 = vmatmul.mubr.f32.vlgmr.msra.gmra.mrb[16].mxu0 %v269_v49 }
 0x104   :  { %696 = vmatprep.mubr.f32.mxu1 %v276_v50  ;;  %687 = vmatprep.mubr.f32.mxu0 %v270_v51 }
 0x107   :  { %697 = vmatmul.mubr.f32.gmra.mrb[2].mxu1 %v277_v52  ;;  %688 = vmatmul.mubr.f32.gmra.mrb[18].mxu0 %v271_v53 }
 0x108   :  { %699 = vmatprep.mubr.f32.mxu1 %v278_v54  ;;  %690 = vmatprep.mubr.f32.mxu0 %v272_v55 }
 0x10b   :  { %700 = vmatmul.mubr.f32.gmra.mrb[4].mxu1 %v279_v56  ;;  %691 = vmatmul.mubr.f32.gmra.mrb[20].mxu0 %v273_v57 }
 0x10c   :  { %702 = vmatprep.mubr.f32.mxu1 %v280_v58 }
 0x10f   :  { %703 = vmatmul.mubr.f32.gmra.mrb[6].mxu1 %v281_v59 }
 0x110   :  { %705 = vmatprep.mubr.f32.mxu1 %v282_v60 }
 0x113   :  { %706 = vmatmul.mubr.f32.gmra.mrb[8].mxu1 %v283_v61 }
 0x1d6   :  { %v695_v62 = vpop.f32.mrb[0].mxu1  ;;  %v686_v0 = vpop.f32.mrb[16].mxu0 }
 0x1d7   :  { %v380_v1 = vpop.f32.mrb[1].mxu1  ;;  %v350_v2 = vpop.f32.mrb[17].mxu0  ;;  %v494_v3 = vadd.f32 %v695_v62, %v567_v63  ;;  %v488_v4 = vadd.f32 %v686_v0, %v567_v63 }
 0x1d8   :  { %v493_v5 = vadd.f32 %v567_v63, %v380_v1  ;;  %v487_v7 = vadd.f32 %v567_v63, %v350_v2 }
 0x1d9   :  { %v510_v9 = vmax.f32 %v494_v3, 0.0  ;;  %v504_v11 = vmax.f32 %v488_v4, 0.0 }
 0x1da   :  { %v698_v6 = vpop.f32.mrb[2].mxu1  ;;  %v689_v8 = vpop.f32.mrb[18].mxu0  ;;  %v509_v13 = vmax.f32 %v493_v5, 0.0  ;;  %v503_v14 = vmax.f32 %v487_v7, 0.0 }
 0x1db   :  { %v390_v10 = vpop.f32.mrb[3].mxu1  ;;  %v360_v12 = vpop.f32.mrb[19].mxu0  ;;  %526 = vst [vmem:[#allocation2 + $0x38] sm:$0xff] %v510_v9  ;;  %v496_v15 = vadd.f32 %v698_v6, %v567_v63  ;;  %520 = vst [vmem:[#allocation2 + $0x8] sm:$0xff] %v504_v11  ;;  %v490_v16 = vadd.f32 %v689_v8, %v567_v63 }
 0x1dc   :  { %525 = vst [vmem:[#allocation2 + $0x30] sm:$0xff] %v509_v13  ;;  %v495_v17 = vadd.f32 %v567_v63, %v390_v10  ;;  %519 = vst [vmem:[#allocation2] sm:$0xff] %v503_v14  ;;  %v489_v19 = vadd.f32 %v567_v63, %v360_v12 }
 0x1dd   :  { %v512_v21 = vmax.f32 %v496_v15, 0.0  ;;  %v506_v23 = vmax.f32 %v490_v16, 0.0 }
 0x1de   :  { %v701_v18 = vpop.f32.mrb[4].mxu1  ;;  %v692_v20 = vpop.f32.mrb[20].mxu0  ;;  %v511_v25 = vmax.f32 %v495_v17, 0.0  ;;  %v505_v26 = vmax.f32 %v489_v19, 0.0 }
 0x1df   :  { %v400_v22 = vpop.f32.mrb[5].mxu1  ;;  %v370_v24 = vpop.f32.mrb[21].mxu0  ;;  %528 = vst [vmem:[#allocation2 + $0x48] sm:$0xff] %v512_v21  ;;  %v498_v27 = vadd.f32 %v701_v18, %v567_v63  ;;  %522 = vst [vmem:[#allocation2 + $0x18] sm:$0xff] %v506_v23  ;;  %v492_v28 = vadd.f32 %v692_v20, %v567_v63 }
 0x1e0   :  { %527 = vst [vmem:[#allocation2 + $0x40] sm:$0xff] %v511_v25  ;;  %v497_v29 = vadd.f32 %v567_v63, %v400_v22  ;;  %521 = vst [vmem:[#allocation2 + $0x10] sm:$0xff] %v505_v26  ;;  %v491_v31 = vadd.f32 %v567_v63, %v370_v24 }
 0x1e1   :  { %v514_v32 = vmax.f32 %v498_v27, 0.0  ;;  %v508_v34 = vmax.f32 %v492_v28, 0.0 }
 0x1e2   :  { %v704_v30 = vpop.f32.mrb[6].mxu1  ;;  %v513_v35 = vmax.f32 %v497_v29, 0.0  ;;  %v507_v36 = vmax.f32 %v491_v31, 0.0 }
 0x1e3   :  { %v410_v33 = vpop.f32.mrb[7].mxu1  ;;  %530 = vst [vmem:[#allocation2 + $0x58] sm:$0xff] %v514_v32  ;;  %v500_v37 = vadd.f32 %v704_v30, %v567_v63  ;;  %524 = vst [vmem:[#allocation2 + $0x28] sm:$0xff] %v508_v34 }
 0x1e4   :  { %529 = vst [vmem:[#allocation2 + $0x50] sm:$0xff] %v513_v35  ;;  %v499_v38 = vadd.f32 %v567_v63, %v410_v33  ;;  %523 = vst [vmem:[#allocation2 + $0x20] sm:$0xff] %v507_v36 }
 0x1e5   :  { %v516_v40 = vmax.f32 %v500_v37, 0.0 }
 0x1e6   :  { %v707_v39 = vpop.f32.mrb[8].mxu1  ;;  %v515_v42 = vmax.f32 %v499_v38, 0.0 }
 0x1e7   :  { %v420_v41 = vpop.f32.mrb[9].mxu1  ;;  %532 = vst [vmem:[#allocation2 + $0x68] sm:$0xff] %v516_v40  ;;  %v502_v43 = vadd.f32 %v707_v39, %v567_v63 }
 0x1e8   :  { %531 = vst [vmem:[#allocation2 + $0x60] sm:$0xff] %v515_v42  ;;  %v501_v44 = vadd.f32 %v567_v63, %v420_v41 }
 0x1e9   :  { %v518_v45 = vmax.f32 %v502_v43, 0.0 }
 0x1ea   :  { %v517_v46 = vmax.f32 %v501_v44, 0.0 }
 0x1eb   :  { %534 = vst [vmem:[#allocation2 + $0x78] sm:$0xff] %v518_v45 }
 0x1ec   :  { %533 = vst [vmem:[#allocation2 + $0x70] sm:$0xff] %v517_v46 }
 0x1ed   :  { %779 = shalt.err (!%p776_p4)
}
 0x1ee   :  { %s780_s9 = scalar_lea.hbm %s963_s4, 2048 }
 0x1ef   :  { %p781_p5 = scmp.ne.s32.totalorder %s963_s4, %s780_s9  ;;  %p784_p6 = scmp.lt.u32.totalorder %s780_s9, %s963_s4 }
 0x1f1   :  { %p786_p7 = pnand %p784_p6, %p781_p5 }
 0x1f3   :  { %789 = shalt.err (!%p786_p7)
}
 0x1f4   :  { %s793_s14 = smov 128   ;;  %s794_s15 = smov 8  }
 0x1f5   :  { %546 = dma.vmem_to_hbm [thread:$0]  %s541_s3, 2048, %s963_s4, [#allocation3], %s793_s14, %s793_s14, %s794_s15  }
 0x1f6   :  { %790 = dma.done.wait [#allocation3], 2048  }
 0x1f7   :  { %791 = vsyncadd [#allocation3], 4294965248 }
 0x1f8   :  { %550 = vsyncpa [#allocation3], 1 }

</bundles_post_ra>
